<compile_context>
chip_gen: v6e
topology: v6e:2x2x1
jax: 0.10.0
libtpu: 0.0.40
codegen_flags: <defaults>
</compile_context>

<pallas_src>
import math
import functools

import jax
import jax.numpy as jnp
from jax.experimental import pallas as pl
from jax.experimental.pallas import tpu as pltpu


# Safe scoped-VMEM budget across v5e/v6e (128 MiB) and v7x (64 MiB per TC).
_VMEM_LIMIT = 64 * 1024 * 1024


def _round_up(x, m):
    return ((x + m - 1) // m) * m


def _pick_tile(dim, prefs):
    for p in prefs:
        if dim % p == 0:
            return p
    return dim


# ----------------------------------------------------------------------------
# Tiled matmul kernel: out = act(A @ W + b)   (used for the final linear layer)
# Grid (M/tm, N/tn, K/tk), f32 VMEM accumulator, bf16 operands.
# ----------------------------------------------------------------------------
def _mm_kernel(a_ref, w_ref, b_ref, o_ref, acc_ref, *, leaky):
    k = pl.program_id(2)

    @pl.when(k == 0)
    def _init():
        acc_ref[...] = jnp.zeros_like(acc_ref)

    acc_ref[...] += jnp.dot(a_ref[...], w_ref[...],
                            preferred_element_type=jnp.float32)

    @pl.when(k == pl.num_programs(2) - 1)
    def _finalize():
        r = acc_ref[...] + b_ref[...]          # (tm,tn) + (1,tn), f32
        if leaky:
            r = jnp.where(r >= 0.0, r, 0.2 * r)
        o_ref[...] = r.astype(o_ref.dtype)


def matmul_bias_act(a, w, b, *, leaky, out_dtype=jnp.float32):
    """a: (M,K) bf16 (M%8==0, K%128==0); w: (K,N) bf16 (N%128==0); b: (1,N) f32."""
    M, K = a.shape
    N = w.shape[1]
    tm = _pick_tile(M, (256, 128, 64, 32, 16, 8))
    tn = _pick_tile(N, (256, 128))
    tk = _pick_tile(K, (512, 256, 128))
    grid = (M // tm, N // tn, K // tk)
    return pl.pallas_call(
        functools.partial(_mm_kernel, leaky=leaky),
        out_shape=jax.ShapeDtypeStruct((M, N), out_dtype),
        grid=grid,
        in_specs=[
            pl.BlockSpec((tm, tk), lambda i, j, k: (i, k)),
            pl.BlockSpec((tk, tn), lambda i, j, k: (k, j)),
            pl.BlockSpec((1, tn), lambda i, j, k: (0, j)),   # bias per N tile
        ],
        out_specs=pl.BlockSpec((tm, tn), lambda i, j, k: (i, j)),
        scratch_shapes=[pltpu.VMEM((tm, tn), jnp.float32)],
        compiler_params=pltpu.CompilerParams(
            dimension_semantics=("parallel", "parallel", "arbitrary"),
            vmem_limit_bytes=_VMEM_LIMIT),
    )(a, w, b)


# ----------------------------------------------------------------------------
# Conv kernel (equalized-LR conv + optional LeakyReLU), no im2col in HBM.
# One grid step = one batch element x one Cout tile.  The kh*kw taps are an
# in-kernel unrolled reduction; each tap is a (Ho*Wo, Cin) x (Cin, tn) matmul
# accumulated in f32.
# ----------------------------------------------------------------------------
def _conv_kernel(x_ref, w_ref, b_ref, o_ref, *, kh, kw, ho, wo, cin, leaky):
    # x_ref: (1, Hp, Wp, Cin)      bf16  (padded plane, one batch element)
    # w_ref: (kh*kw*Cin, tn)       bf16  (tap-major rows, equal-LR scale folded)
    # b_ref: (1, tn)               f32
    # o_ref: (1, ho, wo, tn)       bf16/f32
    tn = o_ref.shape[-1]
    acc = jnp.zeros((ho * wo, tn), jnp.float32)
    for t in range(kh * kw):                       # static, unrolled
        i, j = t // kw, t % kw
        a = x_ref[0, i:i + ho, j:j + wo, :].reshape(ho * wo, cin)
        acc = acc + jnp.dot(a, w_ref[t * cin:(t + 1) * cin, :],
                            preferred_element_type=jnp.float32)
    r = acc + b_ref[...]
    if leaky:
        r = jnp.where(r >= 0.0, r, 0.2 * r)
    o_ref[...] = r.reshape(1, ho, wo, tn).astype(o_ref.dtype)


def equal_conv2d(x, cp, *, leaky=True):
    """EqualLRConv2d (+ optional LeakyReLU). x: (B,H,W,C) with C == cp['cin']."""
    B, H, W, C = x.shape
    kh, kw, pad = cp["kh"], cp["kw"], cp["pad"]
    cin_p, cout_p, cout = cp["cin_pad"], cp["cout_pad"], cp["cout"]
    ho = H + 2 * pad - kh + 1
    wo = W + 2 * pad - kw + 1
    hp, wp = H + 2 * pad, W + 2 * pad
    # Spatial conv padding + channel padding to lane alignment, in bf16.
    xp = jnp.pad(x.astype(jnp.bfloat16),
                 ((0, 0), (pad, pad), (pad, pad), (0, cin_p - C)))
    tn = _pick_tile(cout_p, (256, 128))
    # TODO(synk): for very large resolutions (>=256x256) add halo-tiled spatial
    # blocking so a single plane does not have to fit VMEM in one shot.
    out = pl.pallas_call(
        functools.partial(_conv_kernel, kh=kh, kw=kw, ho=ho, wo=wo,
                          cin=cin_p, leaky=leaky),
        out_shape=jax.ShapeDtypeStruct((B, ho, wo, cout_p), jnp.bfloat16),
        grid=(B, cout_p // tn),
        in_specs=[
            # Input plane independent of cout axis -> fetched once per batch el.
            pl.BlockSpec((1, hp, wp, cin_p), lambda b, j: (b, 0, 0, 0)),
            pl.BlockSpec((kh * kw * cin_p, tn), lambda b, j: (0, j)),
            pl.BlockSpec((1, tn), lambda b, j: (0, j)),
        ],
        out_specs=pl.BlockSpec((1, ho, wo, tn), lambda b, j: (b, 0, 0, j)),
        compiler_params=pltpu.CompilerParams(
            dimension_semantics=("parallel", "parallel"),
            vmem_limit_bytes=_VMEM_LIMIT),
    )(xp, cp["w"], cp["b"])
    return out[..., :cout] if cout != cout_p else out


def equal_linear(x, lp):
    """EqualLRLinear. x: (B, in_features)."""
    B, K = x.shape
    mp = _round_up(B, 8)
    a = jnp.zeros((mp, lp["kp"]), jnp.bfloat16).at[:B, :K].set(
        x.astype(jnp.bfloat16))
    out = matmul_bias_act(a, lp["w"], lp["b"], leaky=False,
                          out_dtype=jnp.float32)
    return out[:B, :lp["n"]]


# ----------------------------------------------------------------------------
# Plain-JAX glue (cheap, bf16): 0.5x bilinear (== 2x2 avg pool), mb-stddev.
# ----------------------------------------------------------------------------
def downsample_half(x):
    # F.interpolate(scale_factor=0.5, mode='bilinear', align_corners=False)
    # equals 2x2 average pooling at exactly 0.5 scale.  Runs on bf16 data.
    # TODO(synk): fuse this pool into the preceding conv kernel's epilogue to
    # save one full-resolution memory pass per pyramid level.
    B, H, W, C = x.shape
    y = x.astype(jnp.float32).reshape(B, H // 2, 2, W // 2, 2, C).mean(axis=(2, 4))
    return y.astype(jnp.bfloat16)


def minibatch_stddev(x):
    xf = x.astype(jnp.float32)
    mean_std = jnp.mean(jnp.sqrt(jnp.var(xf, axis=0) + 1e-8))
    feat = jnp.full((x.shape[0], x.shape[1], x.shape[2], 1), mean_std,
                    jnp.bfloat16)
    return jnp.concatenate([x.astype(jnp.bfloat16), feat], axis=-1)


def d_conv_block(x, bp):
    if bp["mbatch"]:
        x = minibatch_stddev(x)
    x = equal_conv2d(x, bp["conv1"], leaky=True)
    x = equal_conv2d(x, bp["conv2"], leaky=True)
    return x


# ----------------------------------------------------------------------------
# Parameters: raw (PyTorch layout) init + one-time kernel-ready preprocessing.
# ----------------------------------------------------------------------------
def init_params(key, out_c):
    c4, c2 = out_c // 4, out_c // 2
    block_cfg = [
        (c4, c4, 3, 1, 3, 1, False),
        (c4, c2, 3, 1, 3, 1, False),
        (c2, out_c, 3, 1, 3, 1, False),
        (out_c, out_c, 3, 1, 3, 1, False),
        (out_c, out_c, 3, 1, 3, 1, False),
        (out_c, out_c, 3, 1, 3, 1, False),
        (out_c + 1, out_c, 3, 1, 4, 0, True),
    ]
    from_rgb_cout = [c4, c4, c2, out_c, out_c, out_c, out_c]

    keys = jax.random.split(key, 2 * len(block_cfg) + len(from_rgb_cout) + 1)
    it = iter(keys)

    blocks = []
    for (ci, co, k1, p1, k2, p2, mb) in block_cfg:
        blocks.append(dict(
            w1=jax.random.normal(next(it), (co, ci, k1, k1), jnp.float32),
            b1=jnp.zeros((co,), jnp.float32), pad1=p1,
            w2=jax.random.normal(next(it), (co, co, k2, k2), jnp.float32),
            b2=jnp.zeros((co,), jnp.float32), pad2=p2,
            mbatch=mb,
        ))

    from_rgb = []
    for co in from_rgb_cout:
        from_rgb.append(dict(
            w=jax.random.normal(next(it), (co, 3, 1, 1), jnp.float32),
            b=jnp.zeros((co,), jnp.float32),
        ))

    linear = dict(
        w=jax.random.normal(next(it), (1, out_c), jnp.float32),
        b=jnp.zeros((1,), jnp.float32),
    )
    return dict(blocks=blocks, from_rgb=from_rgb, linear=linear)


def _prep_conv(w, b, pad):
    """Fold equal-LR scale, transpose (Cout,Cin,kh,kw)->tap-major matmul layout,
    pad channels to multiples of 128, cast weights to bf16 (bias stays f32)."""
    cout, cin, kh, kw = w.shape
    scale = math.sqrt(2.0 / (cin * kh * kw))
    cin_p = _round_up(cin, 128)
    cout_p = _round_up(cout, 128)
    wm = jnp.transpose(w, (2, 3, 1, 0)) * scale                # (kh,kw,Cin,Cout)
    wm = jnp.pad(wm, ((0, 0), (0, 0), (0, cin_p - cin), (0, cout_p - cout)))
    wm = wm.reshape(kh * kw * cin_p, cout_p).astype(jnp.bfloat16)
    bp = jnp.pad(b, (0, cout_p - cout)).reshape(1, cout_p).astype(jnp.float32)
    return dict(w=wm, b=bp, kh=kh, kw=kw, pad=pad,
                cin=cin, cin_pad=cin_p, cout=cout, cout_pad=cout_p)


def _prep_linear(w, b):
    n_out, k_in = w.shape
    scale = math.sqrt(2.0 / k_in)
    kp = _round_up(k_in, 128)
    n_p = _round_up(n_out, 128)
    wm = jnp.pad((w * scale).T,
                 ((0, kp - k_in), (0, n_p - n_out))).astype(jnp.bfloat16)
    bp = jnp.pad(b, (0, n_p - n_out)).reshape(1, n_p).astype(jnp.float32)
    return dict(w=wm, b=bp, k=k_in, kp=kp, n=n_out, np=n_p)


def prepare_params(raw):
    blocks = [dict(conv1=_prep_conv(b["w1"], b["b1"], b["pad1"]),
                   conv2=_prep_conv(b["w2"], b["b2"], b["pad2"]),
                   mbatch=b["mbatch"]) for b in raw["blocks"]]
    from_rgb = [_prep_conv(f["w"], f["b"], 0) for f in raw["from_rgb"]]
    linear = _prep_linear(raw["linear"]["w"], raw["linear"]["b"])
    return dict(blocks=blocks, from_rgb=from_rgb, linear=linear)


# ----------------------------------------------------------------------------
# Discriminator forward (mirrors the PyTorch module)
# ----------------------------------------------------------------------------
def discriminator_forward(params, x_nchw, layer_num, alpha):
    num_layers = len(params["blocks"])
    x = jnp.transpose(x_nchw, (0, 2, 3, 1)).astype(jnp.bfloat16)   # NCHW->NHWC
    out = None
    for i in reversed(range(layer_num)):
        idx = num_layers - i - 1
        if i + 1 == layer_num:
            out = equal_conv2d(x, params["from_rgb"][idx], leaky=False)
        out = d_conv_block(out, params["blocks"][idx])
        if i > 0:
            out = downsample_half(out)
            if i + 1 == layer_num and 0 <= alpha < 1:
                skip = downsample_half(x)
                skip = equal_conv2d(skip, params["from_rgb"][idx + 1],
                                    leaky=False)
                out = ((1.0 - alpha) * skip.astype(jnp.float32)
                       + alpha * out.astype(jnp.float32)).astype(jnp.bfloat16)
    # out is (B,1,1,C); flatten == NCHW view(B,-1) since spatial is 1x1.
    out = out.reshape(out.shape[0], -1)
    out = equal_linear(out, params["linear"])
    return out


if __name__ == "__main__":
    key = jax.random.PRNGKey(0)
    pkey, xkey = jax.random.split(key)

    out_c = 32                    # small channel width for the test
    layer_num = 2                 # runs blocks[5], blocks[6] (+ alpha skip)
    alpha = 0.5
    # layer_num=2 -> input resolution 8x8 (final 4x4 conv yields 1x1)
    x = jax.random.normal(xkey, (2, 3, 8, 8), dtype=jnp.float32)   # NCHW

    raw = init_params(pkey, out_c)
    params = prepare_params(raw)          # one-time weight preprocessing

    out = discriminator_forward(params, x, layer_num, alpha)
    out = jax.block_until_ready(out)
    assert out.shape == (2, 1), out.shape
    print("KERNEL_OK")
</pallas_src>

<mosaic_0001>
module attributes {stable_mosaic.version = 11 : i64} {
  func.func @_conv_kernel(%arg0: i32, %arg1: i32, %arg2: memref<1x8x8x128xbf16, #tpu.memory_space<vmem>>, %arg3: memref<128x128xbf16, #tpu.memory_space<vmem>>, %arg4: memref<1x128xf32, #tpu.memory_space<vmem>>, %arg5: memref<1x8x8x128xbf16, #tpu.memory_space<vmem>>) attributes {dimension_semantics = [#tpu.dimension_semantics<parallel>, #tpu.dimension_semantics<parallel>], iteration_bounds = array<i64: 2, 1>, scalar_prefetch = 0 : i64, scratch_operands = 0 : i64, tpu.core_type = #tpu.core_type<tc>, window_params = [{transform_indices = @transform_0, window_bounds = array<i64: 1, 8, 8, 128>}, {transform_indices = @transform_1, window_bounds = array<i64: 128, 128>}, {transform_indices = @transform_2, window_bounds = array<i64: 1, 128>}, {transform_indices = @transform_3, window_bounds = array<i64: 1, 8, 8, 128>}]} {
    %cst = arith.constant 0.000000e+00 : f32
    %0 = vector.broadcast %cst : f32 to vector<64x128xf32>
    %c0 = arith.constant 0 : index
    %c0_0 = arith.constant 0 : index
    %c0_1 = arith.constant 0 : index
    %c0_2 = arith.constant 0 : index
    %1 = vector.load %arg2[%c0, %c0_0, %c0_1, %c0_2] : memref<1x8x8x128xbf16, #tpu.memory_space<vmem>>, vector<1x8x8x128xbf16>
    %2 = vector.shape_cast %1 : vector<1x8x8x128xbf16> to vector<8x8x128xbf16>
    %3 = vector.shape_cast %2 : vector<8x8x128xbf16> to vector<64x128xbf16>
    %c0_3 = arith.constant 0 : index
    %c0_4 = arith.constant 0 : index
    %4 = vector.load %arg3[%c0_3, %c0_4] : memref<128x128xbf16, #tpu.memory_space<vmem>>, vector<128x128xbf16>
    %cst_5 = arith.constant dense<0.000000e+00> : vector<64x128xf32>
    %5 = tpu.matmul %3, %4, %cst_5 {dimension_numbers = #tpu.dot_dimension_numbers<[1], [0], [0], [1], [0, 0, 1, 1], [], []>} : vector<64x128xbf16>, vector<128x128xbf16>, vector<64x128xf32> -> vector<64x128xf32>
    %6 = arith.addf %0, %5 : vector<64x128xf32>
    %c0_6 = arith.constant 0 : index
    %c0_7 = arith.constant 0 : index
    %7 = vector.load %arg4[%c0_6, %c0_7] : memref<1x128xf32, #tpu.memory_space<vmem>>, vector<1x128xf32>
    %8 = vector.broadcast %7 : vector<1x128xf32> to vector<64x128xf32>
    %9 = arith.addf %6, %8 : vector<64x128xf32>
    %10 = vector.shape_cast %9 : vector<64x128xf32> to vector<1x8x8x128xf32>
    %11 = arith.truncf %10 : vector<1x8x8x128xf32> to vector<1x8x8x128xbf16>
    %c0_8 = arith.constant 0 : index
    %c0_9 = arith.constant 0 : index
    %c0_10 = arith.constant 0 : index
    %c0_11 = arith.constant 0 : index
    %12 = vector.load %arg5[%c0_8, %c0_9, %c0_10, %c0_11] : memref<1x8x8x128xbf16, #tpu.memory_space<vmem>>, vector<1x8x8x128xbf16>
    tpu.vector_store %arg5[%c0_8, %c0_9, %c0_10, %c0_11], %11 {strides = array<i32>} : memref<1x8x8x128xbf16, #tpu.memory_space<vmem>>, vector<1x8x8x128xbf16>,
    return
  }
  func.func @transform_0(%arg0: i32, %arg1: i32) -> (i32, i32, i32, i32) {
    %c0_i32 = arith.constant 0 : i32
    %c0_i32_0 = arith.constant 0 : i32
    %c0_i32_1 = arith.constant 0 : i32
    %c0_i32_2 = arith.constant 0 : i32
    return %arg0, %c0_i32, %c0_i32_0, %c0_i32_1 : i32, i32, i32, i32
  }
  func.func @transform_1(%arg0: i32, %arg1: i32) -> (i32, i32) {
    %c0_i32 = arith.constant 0 : i32
    %c0_i32_0 = arith.constant 0 : i32
    return %c0_i32, %arg1 : i32, i32
  }
  func.func @transform_2(%arg0: i32, %arg1: i32) -> (i32, i32) {
    %c0_i32 = arith.constant 0 : i32
    %c0_i32_0 = arith.constant 0 : i32
    return %c0_i32, %arg1 : i32, i32
  }
  func.func @transform_3(%arg0: i32, %arg1: i32) -> (i32, i32, i32, i32) {
    %c0_i32 = arith.constant 0 : i32
    %c0_i32_0 = arith.constant 0 : i32
    %c0_i32_1 = arith.constant 0 : i32
    return %arg0, %c0_i32, %c0_i32_0, %arg1 : i32, i32, i32, i32
  }
}

</mosaic_0001>

<bundles_post_ra>
// kernel: tpu_custom_call.1
= control target key start
LH: loop header
LB: loop body
LE: loop exit
PB: predicated region body
PF: predicated region fallthrough
CT: control target
= control target key end

     0   :  { %8 = vsyncpa [#allocation3], 0  ;;  %s1110_s0 = inlined_call_operand.hbm [shape: bf16[2,8,8,128], index: 0, kind: input, shape index: {}]   ;;  %s1111_s1 = inlined_call_operand.hbm [shape: bf16[128,128], index: 1, kind: input, shape index: {}]   ;;  %s1112_s2 = inlined_call_operand.vmem [shape: f32[1,128], index: 2, kind: input, shape index: {}]   ;;  %s1113_s3 = inlined_call_operand.hbm [shape: bf16[2,8,8,128], index: 3, kind: output, shape index: {}]  }
   0x1   :  { %10 = vsyncpa [#allocation3 + $0x1], 0 }
   0x2   :  { %11 = vsyncpa [#allocation6], 0 }
   0x3   :  { %12 = vsyncpa [#allocation4], 0 }
   0x4   :  { %14 = vsyncpa [#allocation4 + $0x1], 0  ;;  %s910_s12 = smov 0   ;;  %s912_s13 = smov 0  }
   0x5   :  { %s914_s14 = smov 0   ;;  %s916_s15 = smov 0  }
   0x6   :  { %s918_s16 = smov 0   ;;  %s920_s17 = smov 0  }
   0x7 LB: > { %s546_s18 = sadd.s32 4294967295, %s881_s17   ;;  %s547_s19 = sadd.s32 4294967294, %s881_s17   ;;  %s881_s17 = sphi %s920_s17, %s20_s17   ;;  %s877_s16 = sphi %s918_s16, %s1135_s16   ;;  %s873_s15 = sphi %s916_s15, %s1134_s15   ;;  %s869_s14 = sphi %s914_s14, %s1133_s14   ;;  %s865_s13 = sphi %s912_s13, %s1132_s13   ;;  %s861_s12 = sphi %s910_s12, %s1131_s12  }
   0x8   : > { %p52_p0 = scmp.ne.s32.totalorder %s865_s13, %s861_s12  ;;  %p944_p1 = scmp.eq.s32.totalorder %s546_s18, 0 }
   0x9   : > { %p948_p2 = scmp.eq.s32.totalorder %s546_s18, 1  ;;  %p136_p3 = scmp.eq.s32.totalorder %s547_s19, 1 }
   0xa   : > { %p954_p4 = por %p944_p1, %p52_p0  ;;  %p548_p5 = scmp.ge.s32.totalorder %s881_s17, 1 }
   0xb   : > { %p959_p6 = por %p136_p3, %p52_p0  ;;  %p143_p7 = scmp.lt.s32.totalorder %s881_s17, 3 }
   0xc   : > { %s1119_s22 = scalar_select %p954_p4, 1, 0 }
   0xd   : > { %s1120_s23 = scalar_select %p959_p6, 1, 0 }
   0xe   : > { %p964_p8 = pnand %p548_p5, %p143_p7  ;;  %s883_s25 = smov [#allocation5]  }
   0xf   : > { %s157_s26 = sshll.u32 %s883_s25, 4  ;;  %s32_s28 = sadd.s32 1, %s877_s16  ;;  %s158_s26 = int_to_ptr.vmem [resolvable:$true] %s157_s26 }
  0x10   : > { %p662_p9 = pneg %p964_p8  ;;  %s754_s29 = scalar_lea.vmem %s158_s26, 1024 }
  0x11   : > { %p755_p13 = scmp.ne.s32.totalorder %s158_s26, %s754_s29  ;;  %p762_p5 = scmp.lt.s32.totalorder %s158_s26, %s158_s26 }
  0x12   : > { %p973_p11 = pnand %p662_p9, %p944_p1  ;;  %p763_p7 = scmp.lt.s32.totalorder %s754_s29, %s754_s29 }
  0x14   : > { %p745_p12 = pneg %p973_p11  ;;  %p764_p6 = por %p763_p7, %p762_p5 }
  0x16   : > { %p757_p0 = pnand %p755_p13, %p745_p12 }
  0x18   : > { %p758_p3 = pneg %p757_p0 }
  0x1a   : > { %p765_p4 = pnand %p764_p6, %p758_p3 }
  0x1c   : > { %768 = shalt.err (!%p765_p4)
}
  0x1d   : > { %s1115_s30 = smov 64   ;;  %s1116_s4 = smov 4  }
  0x1e   : > { %665 = dma.hbm_to_vmem [thread:$0]  (!%p973_p11), %s1111_s1, 1024, %s158_s26, [#allocation6], %s1115_s30, %s1115_s30, %s1116_s4  }
  0x1f   : > { %p34_p4 = scmp.ge.s32.totalorder %s32_s28, 2  ;;  %s39_s7 = sadd.s32 1, %s869_s14 }
  0x20   : > { %p46_p6 = scmp.ne.s32.totalorder %s869_s14, %s865_s13  ;;  %p47_p9 = scmp.eq.s32.totalorder %s881_s17, 0 }
  0x21   : > { %s1137_s28 = smov (%p34_p4, %s32_s28), 0  ;;  %p675_p0 = scmp.lt.s32.totalorder %s881_s17, 2 }
  0x22   : > { %p994_p12 = por %p47_p9, %p46_p6  ;;  %p1000_p13 = por %p948_p2, %p46_p6 }
  0x23   : > { %s36_s10 = ssub.s32 %s877_s16, %s1137_s28  ;;  %s177_s11 = sand.u32 1, %s869_s14  }
  0x24   : > { %p37_p11 = scmp.eq.s32.totalorder %s36_s10, 0  ;;  %s552_s18 = sshll.u32 %s177_s11, 5 }
  0x25   : > { %s577_s25 = sshll.u32 %s877_s16, 9  ;;  %s181_s5 = scalar_lea.vmem [#allocation2], %s552_s18 }
  0x26   : > { %s1009_s19 = scalar_select %p37_p11, %s869_s14, %s39_s7  }
  0x27   : > { %s187_s29 = scalar_lea.hbm %s1110_s0, %s577_s25  ;;  %s188_s6 = sshll.u32 %s181_s5, 4  ;;  %s189_s6 = int_to_ptr.vmem [resolvable:$true] %s188_s6 }
  0x28   : > { %p1017_p2 = pnand %p675_p0, %p994_p12  ;;  %s178_s30 = scalar_lea.sflag [#allocation3], %s177_s11 }
  0x29   : > { %s782_s10 = scalar_lea.vmem %s189_s6, 512  ;;  %s886_s7 = smov [#allocation2]  }
  0x2a   : > { %p771_p3 = pneg %p1017_p2  ;;  %p783_p5 = scmp.ne.s32.totalorder %s189_s6, %s782_s10 }
  0x2b   : > { %s787_s4 = sshll.u32 %s886_s7, 4  ;;  %s788_s4 = int_to_ptr.vmem [resolvable:$false] %s787_s4 }
  0x2c   : > { %p785_p7 = pnand %p783_p5, %p771_p3  ;;  %s789_s25 = scalar_lea.vmem %s788_s4, 1024 }
  0x2d   : > { %p790_p6 = scmp.lt.s32.totalorder %s189_s6, %s788_s4  ;;  %p791_p9 = scmp.lt.s32.totalorder %s789_s25, %s782_s10 }
  0x2e   : > { %p786_p4 = pneg %p785_p7 }
  0x2f   : > { %p792_p11 = por %p791_p9, %p790_p6 }
  0x31   : > { %p793_p10 = pnand %p792_p11, %p786_p4 }
  0x33   : > { %796 = shalt.err (!%p793_p10)
}
  0x34   : > { %s1126_s8 = smov 4   ;;  %s1127_s18 = smov 64  }
  0x35   : > { %669 = dma.hbm_to_vmem [thread:$0]  (!%p1017_p2), %s187_s29, 512, %s189_s6, %s178_s30, %s1127_s18, %s1127_s18, %s1126_s8  }
  0x36   : > { %200 = sbr.rel (%p964_p8) target bundleno = 312 (0x138), region = 32  ;;  %s1031_s11 = sand.u32 (!%p964_p8), 1, %s865_s13  }
  0x37   : > { %s556_s4 = sshll.u32 (!%p964_p8), %s1031_s11, 5  ;;  %s203_s26 = scalar_lea.sflag (!%p964_p8), [#allocation3], %s1031_s11 }
  0x38   : > { %s1037_s27 = scalar_lea.vmem (!%p964_p8), [#allocation2], %s556_s4  ;;  %p1128_p10 = scmp.ne.s32.totalorder (!%p964_p8), %s1119_s22, 0 }
  0x3b   : > { %848 = dma.done.wait (%p1128_p10), %s203_s26, 512  }
  0x3c   : > { %850 = vsyncadd (%p1128_p10), %s203_s26, 4294966784 }
  0x3d   : > { %852 = dma.done.wait (%p944_p1), [#allocation6], 1024  }
  0x3e   : > { %854 = vsyncadd (%p944_p1), [#allocation6], 4294966272  ;;  %v731_v0 = vld [vmem:[#allocation5 + $0x38] sm:$0xff]   ;;  %v732_v1 = vld [vmem:[#allocation5 + $0x30] sm:$0xff]   ;;  %s235_s24 = scalar_lea.vmem [#allocation7], %s556_s4  ;;  %s578_s29 = sshll.u32 %s873_s15, 9 }
  0x3f   : > { %614 = vmatprep.subr.bf16.mxu0 %v731_v0  ;;  %638 = vmatprep.subr.bf16.mxu1 %v731_v0  ;;  %v733_v2 = vld [vmem:[#allocation5 + $0x28] sm:$0xff]   ;;  %v734_v3 = vld [vmem:[#allocation5 + $0x20] sm:$0xff]   ;;  %v740_v5 = vld [vmem:[%s1037_s27 + $0x10] sm:$0xff]   ;;  %s439_s30 = sshll.u32 %s235_s24, 4  ;;  %s1062_s21 = scalar_lea.hbm %s1113_s3, %s578_s29  ;;  %s1057_s30 = int_to_ptr.vmem [resolvable:$true] %s439_s30 }
  0x40   : > { %615 = vmatpush3.bf16.msra.mxu0 %v731_v0  ;;  %646 = vmatpush3.bf16.msra.mxu1 %v731_v0  ;;  %v739_v4 = vld [vmem:[%s1037_s27] sm:$0xff]   ;;  %v735_v6 = vld [vmem:[#allocation5 + $0x18] sm:$0xff]   ;;  %v736_v7 = vld [vmem:[#allocation5 + $0x10] sm:$0xff]   ;;  %s425_s15 = scalar_lea.sflag [#allocation4], %s1031_s11  ;;  %s797_s10 = scalar_lea.vmem %s1057_s30, 512 }
  0x41   : > { %616 = vmatprep.subr.bf16.mxu0 %v732_v1  ;;  %639 = vmatprep.subr.bf16.mxu1 %v732_v1  ;;  %v737_v8 = vld [vmem:[#allocation5 + $0x8] sm:$0xff]   ;;  %v738_v9 = vld [vmem:[#allocation5] sm:$0xff]   ;;  %v742_v11 = vld [vmem:[%s1037_s27 + $0x18] sm:$0xff]   ;;  %p798_p1 = scmp.ne.s32.totalorder %s1057_s30, %s797_s10  ;;  %s887_s7 = smov [#allocation7]  }
  0x42   : > { %630 = vmatprep.mubr.bf16.mxu0 %v739_v4  ;;  %634 = vmatprep.mubr.bf16.mxu1 %v740_v5  ;;  %v741_v10 = vld [vmem:[%s1037_s27 + $0x8] sm:$0xff]   ;;  %v559_v14 = vld [vmem:[%s1112_s2] ss:$0 sm:$0xff]  ;;  %s801_s25 = sshll.u32 %s887_s7, 4  ;;  %s802_s25 = int_to_ptr.vmem [resolvable:$false] %s801_s25 }
  0x43   : > { %p799_p8 = pnand %p798_p1, %p1000_p13  ;;  %s803_s8 = scalar_lea.vmem %s802_s25, 1024 }
  0x44   : > { %617 = vmatpush3.bf16.msra.mxu0 %v732_v1  ;;  %647 = vmatpush3.bf16.msra.mxu1 %v732_v1  ;;  %p804_p0 = scmp.lt.s32.totalorder %s1057_s30, %s802_s25  ;;  %p805_p2 = scmp.lt.s32.totalorder %s803_s8, %s797_s10 }
  0x45   : > { %618 = vmatprep.subr.bf16.mxu0 %v733_v2  ;;  %640 = vmatprep.subr.bf16.mxu1 %v733_v2  ;;  %p800_p12 = pneg %p799_p8 }
  0x46   : > { %p806_p3 = por %p805_p2, %p804_p0 }
  0x48   : > { %619 = vmatpush3.bf16.msra.mxu0 %v733_v2  ;;  %648 = vmatpush3.bf16.msra.mxu1 %v733_v2  ;;  %p807_p5 = pnand %p806_p3, %p800_p12 }
  0x49   : > { %620 = vmatprep.subr.bf16.mxu0 %v734_v3  ;;  %641 = vmatprep.subr.bf16.mxu1 %v734_v3 }
  0x4c   : > { %621 = vmatpush3.bf16.msra.mxu0 %v734_v3  ;;  %649 = vmatpush3.bf16.msra.mxu1 %v734_v3 }
  0x4d   : > { %622 = vmatprep.subr.bf16.mxu0 %v735_v6  ;;  %642 = vmatprep.subr.bf16.mxu1 %v735_v6 }
  0x50   : > { %623 = vmatpush3.bf16.msra.mxu0 %v735_v6  ;;  %650 = vmatpush3.bf16.msra.mxu1 %v735_v6 }
  0x51   : > { %624 = vmatprep.subr.bf16.mxu0 %v736_v7  ;;  %643 = vmatprep.subr.bf16.mxu1 %v736_v7 }
  0x54   : > { %625 = vmatpush3.bf16.msra.mxu0 %v736_v7  ;;  %651 = vmatpush3.bf16.msra.mxu1 %v736_v7 }
  0x55   : > { %626 = vmatprep.subr.bf16.mxu0 %v737_v8  ;;  %644 = vmatprep.subr.bf16.mxu1 %v737_v8 }
  0x58   : > { %627 = vmatpush3.bf16.msra.mxu0 %v737_v8  ;;  %652 = vmatpush3.bf16.msra.mxu1 %v737_v8 }
  0x59   : > { %628 = vmatprep.subr.bf16.mxu0 %v738_v9  ;;  %645 = vmatprep.subr.bf16.mxu1 %v738_v9 }
  0x5c   : > { %629 = vmatpush3.bf16.msra.mxu0 %v738_v9  ;;  %653 = vmatpush3.bf16.msra.mxu1 %v738_v9 }
  0x5f   : > { %631 = vmatmul.mubr.bf16.vlgmr.msra.gmra.mxu0 %v741_v10  ;;  %635 = vmatmul.mubr.bf16.vlgmr.msra.gmra.mxu1 %v742_v11 }
 0x11f   : > { %v632_v12 = vpop.f32.mrf.mxu0  ;;  %v636_v13 = vpop.f32.mrf.mxu1 }
 0x120   : > { %v386_v19 = vadd.f32 %v632_v12, %v559_v14  ;;  %v402_v20 = vadd.f32 %v636_v13, %v559_v14 }
 0x121   : > { %v377_v15 = vpop.f32.mrf.mxu0  ;;  %v393_v16 = vpop.f32.mrf.mxu1 }
 0x122   : > { %v378_v23 = vadd.f32 %v559_v14, %v377_v15  ;;  %v394_v24 = vadd.f32 %v559_v14, %v393_v16 }
 0x123   : > { %v633_v17 = vpop.f32.mrf.mxu0  ;;  %v637_v18 = vpop.f32.mrf.mxu1 }
 0x124   : > { %v389_v21 = vadd.f32 %v633_v17, %v559_v14  ;;  %v405_v22 = vadd.f32 %v637_v18, %v559_v14 }
 0x125   : > { %v380_v25 = vpop.f32.mrf.mxu0  ;;  %v396_v26 = vpop.f32.mrf.mxu1 }
 0x126   : > { %v587_v27 = vpack.c.bf16 %v389_v21, %v386_v19  ;;  %v597_v28 = vpack.c.bf16 %v405_v22, %v402_v20  ;;  %v381_v29 = vadd.f32 %v559_v14, %v380_v25  ;;  %v397_v30 = vadd.f32 %v559_v14, %v396_v26 }
 0x128   : > { %599 = vst [vmem:[%s235_s24 + $0x8] sm:$0xff] %v587_v27   ;;  %601 = vst [vmem:[%s235_s24 + $0x18] sm:$0xff] %v597_v28   ;;  %v582_v31 = vpack.c.bf16 %v381_v29, %v378_v23  ;;  %v592_v32 = vpack.c.bf16 %v397_v30, %v394_v24 }
 0x12a   : > { %583 = vst [vmem:[%s235_s24] sm:$0xff] %v582_v31   ;;  %600 = vst [vmem:[%s235_s24 + $0x10] sm:$0xff] %v592_v32  }
 0x12b   : > { %810 = shalt.err (!%p807_p5)
}
 0x12c   : > { %s811_s18 = scalar_lea.hbm %s1062_s21, 512  ;;  %s815_s27 = scalar_lea.hbm %s1113_s3, 1024 }
 0x12d   : > { %p812_p7 = scmp.ne.s32.totalorder %s1062_s21, %s811_s18  ;;  %p816_p9 = scmp.lt.s32.totalorder %s1062_s21, %s1113_s3 }
 0x12e   : > { %p817_p11 = scmp.lt.s32.totalorder %s815_s27, %s811_s18 }
 0x12f   : > { %p813_p4 = pnand %p812_p7, %p1000_p13 }
 0x130   : > { %p818_p10 = por %p817_p11, %p816_p9 }
 0x131   : > { %p814_p6 = pneg %p813_p4 }
 0x133   : > { %p819_p1 = pnand %p818_p10, %p814_p6 }
 0x135   : > { %822 = shalt.err (!%p819_p1)
}
 0x136   : > { %s888_s24 = smov 64   ;;  %s889_s29 = smov 4  }
 0x137   : > { %660 = dma.vmem_to_hbm [thread:$0]  (%p1000_p13), %s1057_s30, 512, %s1062_s21, %s425_s15, %s888_s24, %s888_s24, %s889_s29  }
 0x138 PF: > { %s454_s5 = sand.u32 1, %s861_s12   ;;  %p1129_p8 = scmp.ne.s32.totalorder %s1120_s23, 0 }
 0x139   : > { %p1130_p12 = scmp.ge.s32.totalorder %s881_s17, 2  ;;  %s455_s6 = scalar_lea.sflag [#allocation4], %s454_s5 }
 0x13b   : > { %p671_p0 = pnand %p1130_p12, %p1129_p8 }
 0x13d   : > { %p672_p2 = pneg %p671_p0 }
 0x13f   : > { %856 = dma.done.wait (%p672_p2), %s455_s6, 512  }
 0x140   : > { %858 = vsyncadd (%p672_p2), %s455_s6, 4294966784  ;;  %s20_s17 = sadd.s32 1, %s881_s17   ;;  %s1131_s12 = smov %s865_s13 }
 0x141   : > { %p17_p3 = scmp.ge.s32.totalorder %s20_s17, 4   ;;  %s1132_s13 = smov %s869_s14 }
 0x142   : > { %s1133_s14 = smov %s1009_s19  ;;  %s1134_s15 = smov %s877_s16 }
 0x143   : > { %s1135_s16 = smov %s1137_s28  ;;  %19 = sbr.rel (!%p17_p3) target bundleno = 7 (0x7), region = 85 }
 0x148   :  { %460 = vsyncpa [#allocation3], 1 }
 0x149   :  { %462 = vsyncpa [#allocation3 + $0x1], 1 }
 0x14a   :  { %463 = vsyncpa [#allocation6], 1 }
 0x14b   :  { %464 = vsyncpa [#allocation4], 1 }
 0x14c   :  { %466 = vsyncpa [#allocation4 + $0x1], 1 }

</bundles_post_ra>
